<compile_context>
chip_gen: v5e
topology: v5e:2x2
jax: 0.10.0
libtpu: 0.0.40
codegen_flags: <defaults>
</compile_context>

<pallas_src>
import functools

import numpy as np
import jax
import jax.numpy as jnp
from jax.experimental import pallas as pl
from jax.experimental.pallas import tpu as pltpu


def _generator_kernel(thickness_sup, nd, NL, MM, K,
                      noise_ref, slab64_ref, w2_ref, w5_ref, smrhs_ref, vecs_ref,
                      out_ref):
    f32 = jnp.float32
    mmdt = slab64_ref.dtype                           # MXU operand dtype (f32 default)
    leaky = lambda v: jnp.where(v > 0, v, 0.2 * v)    # LeakyReLU(0.2)
    NLMM, NLK = NL * MM, NL * K

    # Packed bias / BN-shift rows (BN scales + alpha already folded into the weights),
    # plus the (16, NL) thickness-head output weight riding in the same slab.
    b1   = vecs_ref[0:1, 0:64]
    h2   = vecs_ref[1:2, 0:256]
    h3   = vecs_ref[2:3, 0:64]
    h4   = vecs_ref[3:4, 0:64]
    h5x  = vecs_ref[4:5, 0:NLMM]
    bt1f = vecs_ref[5:6, 0:16]
    bt2f = vecs_ref[6:7, 0:NL]
    wt2  = vecs_ref[8:24, 0:NL].astype(mmdt)

    # Stacked 64-lane trunk weight slab: [W1 (nd rows) ; W3 (256) ; W4 (64)].
    w1 = slab64_ref[0:nd, :]
    w3 = slab64_ref[nd:nd + 256, :]
    w4 = slab64_ref[nd + 256:nd + 320, :]

    x = noise_ref[...].astype(mmdt)

    # ---------------- FC trunk (Dropout = identity in eval; BN folded) ----------------
    h = leaky(jnp.dot(x, w1, preferred_element_type=f32) + b1)
    h = leaky(jnp.dot(h.astype(mmdt), w2_ref[...], preferred_element_type=f32) + h2)
    h = leaky(jnp.dot(h.astype(mmdt), w3, preferred_element_type=f32) + h3)
    h = leaky(jnp.dot(h.astype(mmdt), w4, preferred_element_type=f32) + h4)

    # Last trunk matmul; columns = [alpha-scaled material logits | thickness-head Linear1
    # (Wt1) fused offline through the trunk's thickness columns].
    y = jnp.dot(h.astype(mmdt), w5_ref[...], preferred_element_type=f32)   # (TB, NLMM + 16)

    # ---------------- thickness head (BN folded forward into wt2 / bt2f) ----------------
    t = leaky(y[:, NLMM:NLMM + 16] + bt1f)
    t = jnp.dot(t.astype(mmdt), wt2, preferred_element_type=f32) + bt2f
    thick = jax.nn.sigmoid(t) * thickness_sup                               # (TB, NL)

    # -------- grouped softmax over materials + refractive-index mix (flat lane layout) --------
    z = y[:, :NLMM] + h5x                       # already scaled by alpha (folded offline)
    z = z - jnp.max(z, axis=1, keepdims=True)   # row max is constant within each group
    e = jnp.exp(z)
    # One fused matmul: [ block-diag(ndb) | group-sum bcast over K | group-sum bcast over MM ].
    mix = jnp.dot(e.astype(mmdt), smrhs_ref[...], preferred_element_type=f32)  # (TB, 2*NLK+NLMM)
    ri = mix[:, 0:NLK] * pl.reciprocal(mix[:, NLK:2 * NLK], approx=True)
    p = e * pl.reciprocal(mix[:, 2 * NLK:2 * NLK + NLMM], approx=True)

    # Single lane-dense output slab: [ri | p | thick | zero pad] -> one writeback DMA per step;
    # the dominant 128-lane ri store is unmasked.
    out_ref[:, 0:NLK] = ri
    out_ref[:, NLK:NLK + NLMM] = p
    out_ref[:, NLK + NLMM:NLK + NLMM + NL] = thick
    pad = out_ref.shape[1] - (NLK + NLMM + NL)
    if pad > 0:
        out_ref[:, NLK + NLMM + NL:] = jnp.zeros((out_ref.shape[0], pad), f32)


def _default_batch_tile(B):
    """Largest multiple-of-8 tile <= min(B//2, 2048) that divides B (>=2 grid steps on v7x)."""
    if B < 16 or B % 8 != 0:
        return B
    tb = (min(B // 2, 2048) // 8) * 8
    while tb >= 8:
        if B % tb == 0:
            return tb
        tb -= 8
    return B


def generator_pallas(noise, packed, *, thickness_sup, NL, MM, K,
                     batch_tile=None, vmem_limit_bytes=None):
    slab64, w2, w5 = packed["slab64"], packed["w2"], packed["w5"]
    smrhs, vecs, nd_pad = packed["smrhs"], packed["vecs"], packed["nd_pad"]

    B, noise_dim = noise.shape
    noise = noise.astype(jnp.float32)
    if noise_dim < nd_pad:       # pad contraction dim to match zero-padded W1 rows (x8)
        noise = jnp.pad(noise, ((0, 0), (0, nd_pad - noise_dim)))

    TB = batch_tile if batch_tile is not None else _default_batch_tile(B)
    assert B % TB == 0 and (TB % 8 == 0 or TB == B), "batch tile must divide B (multiple of 8)"
    if vmem_limit_bytes is None and TB > 2048:
        vmem_limit_bytes = 64 * 1024 * 1024   # only needed for very large tiles (v5e 16 MiB default)

    NLK, NLMM = NL * K, NL * MM
    total = NLK + NLMM + NL
    OUT_W = max(128, ((total + 127) // 128) * 128)   # lane-dense packed output slab width

    kernel = functools.partial(_generator_kernel, float(thickness_sup),
                               int(nd_pad), int(NL), int(MM), int(K))
    resident = lambda a: pl.BlockSpec(a.shape, lambda i: (0, 0))   # DMA'd once, stays in VMEM

    slab = pl.pallas_call(
        kernel,
        grid=(B // TB,),
        in_specs=[pl.BlockSpec((TB, noise.shape[1]), lambda i: (i, 0)),
                  resident(slab64), resident(w2), resident(w5),
                  resident(smrhs), resident(vecs)],
        out_specs=pl.BlockSpec((TB, OUT_W), lambda i: (i, 0)),
        out_shape=jax.ShapeDtypeStruct((B, OUT_W), jnp.float32),
        compiler_params=pltpu.CompilerParams(
            dimension_semantics=("parallel",),
            vmem_limit_bytes=vmem_limit_bytes),
    )(noise, slab64, w2, w5, smrhs, vecs)

    ri = slab[:, 0:NLK].reshape(B, NL, K)
    p = slab[:, NLK:NLK + NLMM].reshape(B, NL, MM)
    thick = slab[:, NLK + NLMM:NLK + NLMM + NL]
    return thick, ri, p


def _bn_fold(bn, eps=1e-5):
    g, be, m, v = (np.asarray(t, np.float32) for t in bn)
    scale = g / np.sqrt(v + eps)
    return scale, be - m * scale


def fold_and_pack_params(raw, *, NL, MM, K, alpha, weights_dtype=jnp.float32):
    """Fold eval-mode BatchNorms, the softmax temperature alpha, and the thickness-head first
    Linear into the trunk weights; pack everything into 5 resident kernel inputs."""
    (W1, b1, W2, bn2, W3, bn3, W4, bn4, W5, bn5,
     Wt1, bt1, bnt, Wt2, bt2, ndb) = raw
    f = lambda x: np.asarray(x, np.float32)
    W1, b1, W2, W3, W4, W5 = map(f, (W1, b1, W2, W3, W4, W5))
    Wt1, bt1, Wt2, bt2, ndb = map(f, (Wt1, bt1, Wt2, bt2, ndb))
    assert NL * MM <= 256, "vecs slab packing assumes NL*MM <= 256"

    s2, h2 = _bn_fold(bn2)
    s3, h3 = _bn_fold(bn3)
    s4, h4 = _bn_fold(bn4)
    s5, h5 = _bn_fold(bn5)
    st, ht = _bn_fold(bnt)

    # BN scale folds column-wise into the preceding bias-free Linear.
    W2f, W3f, W4f, W5f = W2 * s2, W3 * s3, W4 * s4, W5 * s5

    # Thickness head: LeakyReLU sits between Linear1 and BN, so fold BN forward into Linear2.
    Wt2f = st[:, None] * Wt2
    bt2f = bt2 + ht @ Wt2

    # Split the last trunk layer's columns; fold alpha into the logits and Wt1 into the
    # thickness columns (no nonlinearity between BN5 and the thickness-head Linear1).
    cols_t = np.arange(NL) * (MM + 1)
    cols_x = np.array([n * (MM + 1) + j for n in range(NL) for j in range(1, MM + 1)])
    W5_logit = W5f[:, cols_x] * alpha
    h5x = h5[cols_x] * alpha
    W5_thick = W5f[:, cols_t] @ Wt1                     # (64, 16)
    bt1f = h5[cols_t] @ Wt1 + bt1                       # (16,)
    W5ext = np.concatenate([W5_logit, W5_thick], axis=1)   # (64, NL*MM + 16)

    # Stack the three 64-lane trunk weights into one resident slab (W1 rows zero-padded to x8).
    nd = W1.shape[0]
    nd_pad = -(-nd // 8) * 8
    W1p = np.zeros((nd_pad, W1.shape[1]), np.float32)
    W1p[:nd] = W1
    slab64 = np.concatenate([W1p, W3f, W4f], axis=0)    # (nd_pad + 320, 64)

    # Fused softmax/mix RHS: [block-diag(ndb) | group-sum bcast over K | group-sum bcast over MM].
    eye = np.eye(NL, dtype=np.float32)
    smrhs = np.concatenate([np.kron(eye, ndb),
                            np.kron(eye, np.ones((MM, K), np.float32)),
                            np.kron(eye, np.ones((MM, MM), np.float32))], axis=1)

    # One (24, 256) slab for all remaining vectors + the (16, NL) thickness output weight.
    vecs = np.zeros((24, 256), np.float32)
    vecs[0, :64] = b1
    vecs[1, :256] = h2
    vecs[2, :64] = h3
    vecs[3, :64] = h4
    vecs[4, :NL * MM] = h5x
    vecs[5, :16] = bt1f
    vecs[6, :NL] = bt2f
    vecs[8:24, :NL] = Wt2f

    wd = weights_dtype   # keep f32 on v5e; bf16 optional for v6e/v7x
    return dict(slab64=jnp.asarray(slab64, wd), w2=jnp.asarray(W2f, wd),
                w5=jnp.asarray(W5ext, wd), smrhs=jnp.asarray(smrhs, wd),
                vecs=jnp.asarray(vecs, jnp.float32), nd_pad=int(nd_pad))


if __name__ == "__main__":
    # Small shapes consistent with the module.
    B, NOISE, NL, MM, K = 16, 32, 8, 4, 16      # batch, noise_dim, N_layers, M_materials, wavelengths
    THICK_SUP, ALPHA = 100.0, 5.0
    F5 = NL * (MM + 1)

    key = jax.random.PRNGKey(0)
    keys = iter(jax.random.split(key, 64))
    nxt = lambda: next(keys)
    nrm = lambda shape, scale=0.1: scale * jax.random.normal(nxt(), shape, dtype=jnp.float32)

    noise = nrm((B, NOISE), 1.0)

    W1, b1 = nrm((NOISE, 64)), nrm((64,), 0.01)
    W2 = nrm((64, 256))
    bn2 = (1.0 + nrm((256,)), nrm((256,)), nrm((256,), 0.05), 1.0 + jnp.abs(nrm((256,))))
    W3 = nrm((256, 64))
    bn3 = (1.0 + nrm((64,)), nrm((64,)), nrm((64,), 0.05), 1.0 + jnp.abs(nrm((64,))))
    W4 = nrm((64, 64))
    bn4 = (1.0 + nrm((64,)), nrm((64,)), nrm((64,), 0.05), 1.0 + jnp.abs(nrm((64,))))
    W5 = nrm((64, F5))
    bn5 = (1.0 + nrm((F5,)), nrm((F5,)), nrm((F5,), 0.05), 1.0 + jnp.abs(nrm((F5,))))
    Wt1, bt1 = nrm((NL, 16)), nrm((16,), 0.01)
    bnt = (1.0 + nrm((16,)), nrm((16,)), nrm((16,), 0.05), 1.0 + jnp.abs(nrm((16,))))
    Wt2, bt2 = nrm((16, NL)), nrm((NL,), 0.01)
    ndb = 1.0 + jnp.abs(nrm((MM, K), 1.0))      # refractive indices >= 1

    raw = (W1, b1, W2, bn2, W3, bn3, W4, bn4, W5, bn5, Wt1, bt1, bnt, Wt2, bt2, ndb)

    # ----- pure-JAX reference (mirrors the PyTorch forward in eval mode) -----
    def ref_forward(noise, alpha):
        leaky = lambda v: jnp.where(v > 0, v, 0.2 * v)
        def bn(x, p):
            g, be, m, v = p
            return (x - m) / jnp.sqrt(v + 1e-5) * g + be
        h = leaky(noise @ W1 + b1)              # Dropout(p=0.2) = identity in eval
        h = leaky(bn(h @ W2, bn2))
        h = leaky(bn(h @ W3, bn3))
        h = leaky(bn(h @ W4, bn4))
        net = bn(h @ W5, bn5).reshape(B, NL, MM + 1)
        t = leaky(net[:, :, 0] @ Wt1 + bt1)
        t = bn(t, bnt) @ Wt2 + bt2
        thick_r = jax.nn.sigmoid(t) * THICK_SUP
        Pr = jax.nn.softmax(net[:, :, 1:] * alpha, axis=2)
        ri_r = jnp.einsum('bnm,mk->bnk', Pr, ndb)
        return thick_r, ri_r, Pr

    thick_r, ri_r, P_r = ref_forward(noise, ALPHA)

    # ----- Pallas kernel (f32 weights; v5e/v6e/v7x safe) -----
    packed = fold_and_pack_params(raw, NL=NL, MM=MM, K=K, alpha=ALPHA,
                                  weights_dtype=jnp.float32)
    thick, ri, P = generator_pallas(noise, packed, thickness_sup=THICK_SUP,
                                    NL=NL, MM=MM, K=K)
    jax.block_until_ready((thick, ri, P))

    assert thick.shape == (B, NL) and ri.shape == (B, NL, K) and P.shape == (B, NL, MM)
    np.testing.assert_allclose(np.asarray(thick), np.asarray(thick_r), rtol=2e-2, atol=2e-2)
    np.testing.assert_allclose(np.asarray(ri), np.asarray(ri_r), rtol=2e-2, atol=2e-2)
    np.testing.assert_allclose(np.asarray(P), np.asarray(P_r), rtol=2e-2, atol=2e-2)

    print("KERNEL_OK")
</pallas_src>

<mosaic_0001>
module attributes {stable_mosaic.version = 11 : i64} {
  func.func @_generator_kernel(%arg0: i32, %arg1: memref<8x32xf32, #tpu.memory_space<vmem>>, %arg2: memref<352x64xf32, #tpu.memory_space<vmem>>, %arg3: memref<64x256xf32, #tpu.memory_space<vmem>>, %arg4: memref<64x48xf32, #tpu.memory_space<vmem>>, %arg5: memref<32x288xf32, #tpu.memory_space<vmem>>, %arg6: memref<24x256xf32, #tpu.memory_space<vmem>>, %arg7: memref<8x256xf32, #tpu.memory_space<vmem>>) attributes {dimension_semantics = [#tpu.dimension_semantics<parallel>], iteration_bounds = array<i64: 2>, scalar_prefetch = 0 : i64, scratch_operands = 0 : i64, tpu.core_type = #tpu.core_type<tc>, window_params = [{transform_indices = @transform_0, window_bounds = array<i64: 8, 32>}, {pipeline_mode = #tpu.pipeline_mode<synchronous>, transform_indices = @transform_1, window_bounds = array<i64: 352, 64>}, {pipeline_mode = #tpu.pipeline_mode<synchronous>, transform_indices = @transform_2, window_bounds = array<i64: 64, 256>}, {pipeline_mode = #tpu.pipeline_mode<synchronous>, transform_indices = @transform_3, window_bounds = array<i64: 64, 48>}, {pipeline_mode = #tpu.pipeline_mode<synchronous>, transform_indices = @transform_4, window_bounds = array<i64: 32, 288>}, {pipeline_mode = #tpu.pipeline_mode<synchronous>, transform_indices = @transform_5, window_bounds = array<i64: 24, 256>}, {transform_indices = @transform_6, window_bounds = array<i64: 8, 256>}]} {
    %c0 = arith.constant 0 : index
    %c0_0 = arith.constant 0 : index
    %0 = vector.load %arg6[%c0, %c0_0] : memref<24x256xf32, #tpu.memory_space<vmem>>, vector<1x64xf32>
    %c1 = arith.constant 1 : index
    %c0_1 = arith.constant 0 : index
    %1 = vector.load %arg6[%c1, %c0_1] : memref<24x256xf32, #tpu.memory_space<vmem>>, vector<1x256xf32>
    %c2 = arith.constant 2 : index
    %c0_2 = arith.constant 0 : index
    %2 = vector.load %arg6[%c2, %c0_2] : memref<24x256xf32, #tpu.memory_space<vmem>>, vector<1x64xf32>
    %c3 = arith.constant 3 : index
    %c0_3 = arith.constant 0 : index
    %3 = vector.load %arg6[%c3, %c0_3] : memref<24x256xf32, #tpu.memory_space<vmem>>, vector<1x64xf32>
    %c4 = arith.constant 4 : index
    %c0_4 = arith.constant 0 : index
    %4 = vector.load %arg6[%c4, %c0_4] : memref<24x256xf32, #tpu.memory_space<vmem>>, vector<1x32xf32>
    %c5 = arith.constant 5 : index
    %c0_5 = arith.constant 0 : index
    %5 = vector.load %arg6[%c5, %c0_5] : memref<24x256xf32, #tpu.memory_space<vmem>>, vector<1x16xf32>
    %c6 = arith.constant 6 : index
    %c0_6 = arith.constant 0 : index
    %6 = vector.load %arg6[%c6, %c0_6] : memref<24x256xf32, #tpu.memory_space<vmem>>, vector<1x8xf32>
    %c8 = arith.constant 8 : index
    %c0_7 = arith.constant 0 : index
    %7 = vector.load %arg6[%c8, %c0_7] : memref<24x256xf32, #tpu.memory_space<vmem>>, vector<16x8xf32>
    %c0_8 = arith.constant 0 : index
    %c0_9 = arith.constant 0 : index
    %8 = vector.load %arg2[%c0_8, %c0_9] : memref<352x64xf32, #tpu.memory_space<vmem>>, vector<32x64xf32>
    %c32 = arith.constant 32 : index
    %c0_10 = arith.constant 0 : index
    %9 = vector.load %arg2[%c32, %c0_10] : memref<352x64xf32, #tpu.memory_space<vmem>>, vector<256x64xf32>
    %c288 = arith.constant 288 : index
    %c0_11 = arith.constant 0 : index
    %10 = vector.load %arg2[%c288, %c0_11] : memref<352x64xf32, #tpu.memory_space<vmem>>, vector<64x64xf32>
    %c0_12 = arith.constant 0 : index
    %c0_13 = arith.constant 0 : index
    %11 = vector.load %arg1[%c0_12, %c0_13] : memref<8x32xf32, #tpu.memory_space<vmem>>, vector<8x32xf32>
    %cst = arith.constant dense<0.000000e+00> : vector<8x64xf32>
    %12 = tpu.matmul %11, %8, %cst {dimension_numbers = #tpu.dot_dimension_numbers<[1], [0], [0], [1], [0, 0, 1, 1], [], []>} : vector<8x32xf32>, vector<32x64xf32>, vector<8x64xf32> -> vector<8x64xf32>
    %13 = vector.broadcast %0 : vector<1x64xf32> to vector<8x64xf32>
    %14 = arith.addf %12, %13 : vector<8x64xf32>
    %cst_14 = arith.constant 0.000000e+00 : f32
    %15 = vector.broadcast %cst_14 : f32 to vector<8x64xf32>
    %16 = arith.cmpf ogt, %14, %15 : vector<8x64xf32>
    %cst_15 = arith.constant 2.000000e-01 : f32
    %17 = vector.broadcast %cst_15 : f32 to vector<8x64xf32>
    %18 = arith.mulf %17, %14 : vector<8x64xf32>
    %19 = arith.select %16, %14, %18 : vector<8x64xi1>, vector<8x64xf32>
    %c0_16 = arith.constant 0 : index
    %c0_17 = arith.constant 0 : index
    %20 = vector.load %arg3[%c0_16, %c0_17] : memref<64x256xf32, #tpu.memory_space<vmem>>, vector<64x256xf32>
    %cst_18 = arith.constant dense<0.000000e+00> : vector<8x256xf32>
    %21 = tpu.matmul %19, %20, %cst_18 {dimension_numbers = #tpu.dot_dimension_numbers<[1], [0], [0], [1], [0, 0, 1, 1], [], []>} : vector<8x64xf32>, vector<64x256xf32>, vector<8x256xf32> -> vector<8x256xf32>
    %22 = vector.broadcast %1 : vector<1x256xf32> to vector<8x256xf32>
    %23 = arith.addf %21, %22 : vector<8x256xf32>
    %cst_19 = arith.constant 0.000000e+00 : f32
    %24 = vector.broadcast %cst_19 : f32 to vector<8x256xf32>
    %25 = arith.cmpf ogt, %23, %24 : vector<8x256xf32>
    %cst_20 = arith.constant 2.000000e-01 : f32
    %26 = vector.broadcast %cst_20 : f32 to vector<8x256xf32>
    %27 = arith.mulf %26, %23 : vector<8x256xf32>
    %28 = arith.select %25, %23, %27 : vector<8x256xi1>, vector<8x256xf32>
    %cst_21 = arith.constant dense<0.000000e+00> : vector<8x64xf32>
    %29 = tpu.matmul %28, %9, %cst_21 {dimension_numbers = #tpu.dot_dimension_numbers<[1], [0], [0], [1], [0, 0, 1, 1], [], []>} : vector<8x256xf32>, vector<256x64xf32>, vector<8x64xf32> -> vector<8x64xf32>
    %30 = vector.broadcast %2 : vector<1x64xf32> to vector<8x64xf32>
    %31 = arith.addf %29, %30 : vector<8x64xf32>
    %cst_22 = arith.constant 0.000000e+00 : f32
    %32 = vector.broadcast %cst_22 : f32 to vector<8x64xf32>
    %33 = arith.cmpf ogt, %31, %32 : vector<8x64xf32>
    %cst_23 = arith.constant 2.000000e-01 : f32
    %34 = vector.broadcast %cst_23 : f32 to vector<8x64xf32>
    %35 = arith.mulf %34, %31 : vector<8x64xf32>
    %36 = arith.select %33, %31, %35 : vector<8x64xi1>, vector<8x64xf32>
    %cst_24 = arith.constant dense<0.000000e+00> : vector<8x64xf32>
    %37 = tpu.matmul %36, %10, %cst_24 {dimension_numbers = #tpu.dot_dimension_numbers<[1], [0], [0], [1], [0, 0, 1, 1], [], []>} : vector<8x64xf32>, vector<64x64xf32>, vector<8x64xf32> -> vector<8x64xf32>
    %38 = vector.broadcast %3 : vector<1x64xf32> to vector<8x64xf32>
    %39 = arith.addf %37, %38 : vector<8x64xf32>
    %cst_25 = arith.constant 0.000000e+00 : f32
    %40 = vector.broadcast %cst_25 : f32 to vector<8x64xf32>
    %41 = arith.cmpf ogt, %39, %40 : vector<8x64xf32>
    %cst_26 = arith.constant 2.000000e-01 : f32
    %42 = vector.broadcast %cst_26 : f32 to vector<8x64xf32>
    %43 = arith.mulf %42, %39 : vector<8x64xf32>
    %44 = arith.select %41, %39, %43 : vector<8x64xi1>, vector<8x64xf32>
    %c0_27 = arith.constant 0 : index
    %c0_28 = arith.constant 0 : index
    %45 = vector.load %arg4[%c0_27, %c0_28] : memref<64x48xf32, #tpu.memory_space<vmem>>, vector<64x48xf32>
    %cst_29 = arith.constant dense<0.000000e+00> : vector<8x48xf32>
    %46 = tpu.matmul %44, %45, %cst_29 {dimension_numbers = #tpu.dot_dimension_numbers<[1], [0], [0], [1], [0, 0, 1, 1], [], []>} : vector<8x64xf32>, vector<64x48xf32>, vector<8x48xf32> -> vector<8x48xf32>
    %47 = vector.extract_strided_slice %46 {offsets = [0, 32], sizes = [8, 16], strides = [1, 1]} : vector<8x48xf32> to vector<8x16xf32>
    %48 = vector.broadcast %5 : vector<1x16xf32> to vector<8x16xf32>
    %49 = arith.addf %47, %48 : vector<8x16xf32>
    %cst_30 = arith.constant 0.000000e+00 : f32
    %50 = vector.broadcast %cst_30 : f32 to vector<8x16xf32>
    %51 = arith.cmpf ogt, %49, %50 : vector<8x16xf32>
    %cst_31 = arith.constant 2.000000e-01 : f32
    %52 = vector.broadcast %cst_31 : f32 to vector<8x16xf32>
    %53 = arith.mulf %52, %49 : vector<8x16xf32>
    %54 = arith.select %51, %49, %53 : vector<8x16xi1>, vector<8x16xf32>
    %cst_32 = arith.constant dense<0.000000e+00> : vector<8x8xf32>
    %55 = tpu.matmul %54, %7, %cst_32 {dimension_numbers = #tpu.dot_dimension_numbers<[1], [0], [0], [1], [0, 0, 1, 1], [], []>} : vector<8x16xf32>, vector<16x8xf32>, vector<8x8xf32> -> vector<8x8xf32>
    %56 = vector.broadcast %6 : vector<1x8xf32> to vector<8x8xf32>
    %57 = arith.addf %55, %56 : vector<8x8xf32>
    %58 = arith.negf %57 : vector<8x8xf32>
    %59 = math.exp %58 : vector<8x8xf32>
    %cst_33 = arith.constant 1.000000e+00 : f32
    %60 = vector.broadcast %cst_33 : f32 to vector<8x8xf32>
    %61 = arith.addf %60, %59 : vector<8x8xf32>
    %62 = arith.divf %60, %61 : vector<8x8xf32>
    %cst_34 = arith.constant 1.000000e+02 : f32
    %63 = vector.broadcast %cst_34 : f32 to vector<8x8xf32>
    %64 = arith.mulf %62, %63 : vector<8x8xf32>
    %65 = vector.extract_strided_slice %46 {offsets = [0, 0], sizes = [8, 32], strides = [1, 1]} : vector<8x48xf32> to vector<8x32xf32>
    %66 = vector.broadcast %4 : vector<1x32xf32> to vector<8x32xf32>
    %67 = arith.addf %65, %66 : vector<8x32xf32>
    %cst_35 = arith.constant dense<0xFF800000> : vector<8xf32>
    %68 = vector.multi_reduction <maximumf>, %67, %cst_35 [1] : vector<8x32xf32> to vector<8xf32>
    %69 = vector.shape_cast %68 : vector<8xf32> to vector<8x1xf32>
    %70 = vector.broadcast %69 : vector<8x1xf32> to vector<8x32xf32>
    %71 = arith.subf %67, %70 : vector<8x32xf32>
    %72 = math.exp %71 : vector<8x32xf32>
    %c0_36 = arith.constant 0 : index
    %c0_37 = arith.constant 0 : index
    %73 = vector.load %arg5[%c0_36, %c0_37] : memref<32x288xf32, #tpu.memory_space<vmem>>, vector<32x288xf32>
    %cst_38 = arith.constant dense<0.000000e+00> : vector<8x288xf32>
    %74 = tpu.matmul %72, %73, %cst_38 {dimension_numbers = #tpu.dot_dimension_numbers<[1], [0], [0], [1], [0, 0, 1, 1], [], []>} : vector<8x32xf32>, vector<32x288xf32>, vector<8x288xf32> -> vector<8x288xf32>
    %75 = vector.extract_strided_slice %74 {offsets = [0, 0], sizes = [8, 128], strides = [1, 1]} : vector<8x288xf32> to vector<8x128xf32>
    %76 = vector.extract_strided_slice %74 {offsets = [0, 128], sizes = [8, 128], strides = [1, 1]} : vector<8x288xf32> to vector<8x128xf32>
    %77 = tpu.reciprocal %76 {approx = true} : vector<8x128xf32> -> vector<8x128xf32>
    %78 = arith.mulf %75, %77 : vector<8x128xf32>
    %79 = vector.extract_strided_slice %74 {offsets = [0, 256], sizes = [8, 32], strides = [1, 1]} : vector<8x288xf32> to vector<8x32xf32>
    %80 = tpu.reciprocal %79 {approx = true} : vector<8x32xf32> -> vector<8x32xf32>
    %81 = arith.mulf %72, %80 : vector<8x32xf32>
    %c0_39 = arith.constant 0 : index
    %c0_40 = arith.constant 0 : index
    %82 = vector.load %arg7[%c0_39, %c0_40] : memref<8x256xf32, #tpu.memory_space<vmem>>, vector<8x128xf32>
    tpu.vector_store %arg7[%c0_39, %c0_40], %78 {strides = array<i32>} : memref<8x256xf32, #tpu.memory_space<vmem>>, vector<8x128xf32>,
    %c0_41 = arith.constant 0 : index
    %c128 = arith.constant 128 : index
    %83 = vector.load %arg7[%c0_41, %c128] : memref<8x256xf32, #tpu.memory_space<vmem>>, vector<8x32xf32>
    tpu.vector_store %arg7[%c0_41, %c128], %81 {strides = array<i32>} : memref<8x256xf32, #tpu.memory_space<vmem>>, vector<8x32xf32>,
    %c0_42 = arith.constant 0 : index
    %c160 = arith.constant 160 : index
    %84 = vector.load %arg7[%c0_42, %c160] : memref<8x256xf32, #tpu.memory_space<vmem>>, vector<8x8xf32>
    tpu.vector_store %arg7[%c0_42, %c160], %64 {strides = array<i32>} : memref<8x256xf32, #tpu.memory_space<vmem>>, vector<8x8xf32>,
    %cst_43 = arith.constant 0.000000e+00 : f32
    %85 = vector.broadcast %cst_43 : f32 to vector<8x88xf32>
    %c0_44 = arith.constant 0 : index
    %c168 = arith.constant 168 : index
    %86 = vector.load %arg7[%c0_44, %c168] : memref<8x256xf32, #tpu.memory_space<vmem>>, vector<8x88xf32>
    tpu.vector_store %arg7[%c0_44, %c168], %85 {strides = array<i32>} : memref<8x256xf32, #tpu.memory_space<vmem>>, vector<8x88xf32>,
    return
  }
  func.func @transform_0(%arg0: i32) -> (i32, i32) {
    %c0_i32 = arith.constant 0 : i32
    %c0_i32_0 = arith.constant 0 : i32
    return %arg0, %c0_i32 : i32, i32
  }
  func.func @transform_1(%arg0: i32) -> (i32, i32) {
    %c0_i32 = arith.constant 0 : i32
    %c0_i32_0 = arith.constant 0 : i32
    %c0_i32_1 = arith.constant 0 : i32
    return %c0_i32, %c0_i32_0 : i32, i32
  }
  func.func @transform_2(%arg0: i32) -> (i32, i32) {
    %c0_i32 = arith.constant 0 : i32
    %c0_i32_0 = arith.constant 0 : i32
    %c0_i32_1 = arith.constant 0 : i32
    return %c0_i32, %c0_i32_0 : i32, i32
  }
  func.func @transform_3(%arg0: i32) -> (i32, i32) {
    %c0_i32 = arith.constant 0 : i32
    %c0_i32_0 = arith.constant 0 : i32
    %c0_i32_1 = arith.constant 0 : i32
    return %c0_i32, %c0_i32_0 : i32, i32
  }
  func.func @transform_4(%arg0: i32) -> (i32, i32) {
    %c0_i32 = arith.constant 0 : i32
    %c0_i32_0 = arith.constant 0 : i32
    %c0_i32_1 = arith.constant 0 : i32
    return %c0_i32, %c0_i32_0 : i32, i32
  }
  func.func @transform_5(%arg0: i32) -> (i32, i32) {
    %c0_i32 = arith.constant 0 : i32
    %c0_i32_0 = arith.constant 0 : i32
    %c0_i32_1 = arith.constant 0 : i32
    return %c0_i32, %c0_i32_0 : i32, i32
  }
  func.func @transform_6(%arg0: i32) -> (i32, i32) {
    %c0_i32 = arith.constant 0 : i32
    %c0_i32_0 = arith.constant 0 : i32
    return %arg0, %c0_i32 : i32, i32
  }
}

</mosaic_0001>

<bundles_post_ra>
// kernel: tpu_custom_call.1
= control target key start
LH: loop header
LB: loop body
LE: loop exit
PB: predicated region body
PF: predicated region fallthrough
CT: control target
= control target key end

     0   :  { %11 = vsyncpa [#allocation3], 0  ;;  %s1278_s0 = inlined_call_operand.vmem [shape: f32[16,32], index: 0, kind: input, shape index: {}]   ;;  %s1279_s1 = inlined_call_operand.vmem [shape: f32[352,64], index: 1, kind: input, shape index: {}]   ;;  %s1280_s2 = inlined_call_operand.vmem [shape: f32[64,256], index: 2, kind: input, shape index: {}]   ;;  %s1281_s3 = inlined_call_operand.vmem [shape: f32[64,48], index: 3, kind: input, shape index: {}]   ;;  %s1282_s4 = inlined_call_operand.vmem [shape: f32[32,288], index: 4, kind: input, shape index: {}]   ;;  %s1283_s5 = inlined_call_operand.vmem [shape: f32[24,256], index: 5, kind: input, shape index: {}]   ;;  %s1284_s6 = inlined_call_operand.hbm [shape: f32[16,256], index: 6, kind: output, shape index: {}]  }
   0x1   :  { %13 = vsyncpa [#allocation3 + $0x1], 0  ;;  %s903_s21 = smov 0   ;;  %s905_s22 = smov 0  }
   0x2   :  { %s907_s23 = smov 0   ;;  %s909_s24 = smov 0  }
   0x3 LB: > { %s924_s25 = sadd.s32 4294967295, %s863_s24   ;;  %s726_s26 = sadd.s32 4294967294, %s863_s24   ;;  %s863_s24 = sphi %s909_s24, %s1290_s24   ;;  %s859_s23 = sphi %s907_s23, %s1289_s23   ;;  %s855_s22 = sphi %s905_s22, %s1288_s22   ;;  %s851_s21 = sphi %s903_s21, %s1287_s21  }
   0x4   : > { %s928_s27 = sadd.s32 1, %s863_s24   ;;  %s157_s28 = sadd.s32 1, %s859_s23 }
   0x5   : > { %s154_s29 = ssub.s32 %s863_s24, %s928_s27  ;;  %p167_p0 = scmp.ne.s32.totalorder %s859_s23, %s855_s22 }
   0x6   : > { %p155_p1 = scmp.eq.s32.totalorder %s154_s29, 0  ;;  %p168_p2 = scmp.eq.s32.totalorder %s924_s25, 1 }
   0x7   : > { %p173_p3 = scmp.ne.s32.totalorder %s855_s22, %s851_s21  ;;  %p174_p4 = scmp.eq.s32.totalorder %s726_s26, 1 }
   0x8   : > { %s939_s30 = scalar_select %p155_p1, %s859_s23, %s157_s28  }
   0x9   : > { %p941_p5 = por %p168_p2, %p167_p0  ;;  %p945_p6 = por %p174_p4, %p173_p3 }
   0xa   : > { %p729_p7 = scmp.ge.s32.totalorder %s863_s24, 1  ;;  %p214_p8 = scmp.lt.s32.totalorder %s863_s24, 3 }
   0xc   : > { %p215_p9 = pnand %p729_p7, %p214_p8 }
   0xd   : > { %p243_p10 = scmp.lt.s32.totalorder (!%p215_p9), %s924_s25, 1  ;;  %s866_s17 = smov (!%p215_p9), 96  }
   0xe   : > { %218 = sbr.rel (%p215_p9) target bundleno = 1088 (0x440), region = 44  ;;  %s240_s16 = sand.u32 (!%p215_p9), 1, %s855_s22  }
   0xf   : > { %s748_s20 = sshll.u32 (!%p215_p9), %s924_s25, 4  ;;  %s651_s11 = scalar_lea.sflag (!%p215_p9), [#allocation3], %s240_s16 }
  0x10   : > { %s662_s29 = scalar_lea.hbm (!%p215_p9), %s1284_s6, %s748_s20  ;;  %s821_s14 = scalar_lea.hbm (!%p215_p9), %s1284_s6, 32 }
  0x11   : > { %s666_s10 = sshll.u32 (!%p215_p9), %s662_s29, 4  ;;  %s667_s10 = int_to_ptr.hbm [resolvable:$true] %s666_s10 }
  0x12   : > { %s815_s12 = sshra.s32 (!%p215_p9), %s667_s10, 4  ;;  %s816_s12 = int_to_ptr.hbm [resolvable:$true] %s815_s12 }
  0x13   : > { %v260_v0 = vld [vmem:[%s1279_s1 + $0x18] sm:$0xff]  ;;  %v259_v1 = vld [vmem:[%s1279_s1 + $0x10] sm:$0xff]  ;;  %v258_v4 = vld [vmem:[%s1279_s1 + $0x8] sm:$0xff]  ;;  %s244_s19 = scalar_select %p243_p10, %s924_s25, 1  ;;  %vm302_vm0 = vcmask 261120   ;;  %vm350_vm2 = vcmask 523264  }
  0x14   : > { %318 = vmatpush.msra.mxu0 %v260_v0  ;;  %v343_v2 = vld [vmem:[%s1280_s2 + $0x70] sm:$0xff]  ;;  %v344_v3 = vld [vmem:[%s1280_s2 + $0x78] sm:$0xff]  ;;  %v341_v5 = vld [vmem:[%s1280_s2 + $0x60] sm:$0xff]  ;;  %vm511_vm8 = vcmask 130048   ;;  %vm646_vm13 = vcmask 326912   ;;  %vm648_vm14 = vcmask 1047872   ;;  %p822_p0 = scmp.lt.s32.totalorder %s816_s12, %s1284_s6 }
  0x15   : > { %362 = vmatpush.msra.mxu1 %v343_v2  ;;  %382 = vmatpush.msra.mxu2 %v344_v3  ;;  %v342_v6 = vld [vmem:[%s1280_s2 + $0x68] sm:$0xff]  ;;  %v339_v7 = vld [vmem:[%s1280_s2 + $0x50] sm:$0xff]  ;;  %v340_v8 = vld [vmem:[%s1280_s2 + $0x58] sm:$0xff]  ;;  %s731_s15 = sshll.u32 %s244_s19, 3  ;;  %s865_s19 = smov 32  }
  0x16   : > { %319 = vmatpush.msra.mxu0 %v259_v1  ;;  %v257_v9 = vld [vmem:[%s1279_s1] sm:$0xff]  ;;  %s246_s18 = scalar_lea.vmem %s1278_s0, %s731_s15  ;;  %v338_v12 = vld [vmem:[%s1280_s2 + $0x48] sm:$0xff]  ;;  %v335_v13 = vld [vmem:[%s1280_s2 + $0x30] sm:$0xff]  ;;  %s817_s25 = scalar_lea.hbm %s816_s12, 16 }
  0x17   : > { %363 = vmatpush.msra.mxu1 %v341_v5  ;;  %383 = vmatpush.msra.mxu2 %v342_v6  ;;  %v337_v10 = vld [vmem:[%s1280_s2 + $0x40] sm:$0xff]  ;;  %v336_v14 = vld [vmem:[%s1280_s2 + $0x38] sm:$0xff]  ;;  %v334_v16 = vld [vmem:[%s1280_s2 + $0x28] sm:$0xff]  ;;  %p818_p11 = scmp.ne.s32.totalorder %s816_s12, %s817_s25  ;;  %p823_p1 = scmp.lt.s32.totalorder %s821_s14, %s817_s25 }
  0x18   : > { %320 = vmatpush.msra.mxu0 %v258_v4  ;;  %v301_v11 = vld [vmem:[%s246_s18] sm:$0xff]  ;;  %v331_v17 = vld [vmem:[%s1280_s2 + $0x10] sm:$0xff]  ;;  %v332_v18 = vld [vmem:[%s1280_s2 + $0x18] sm:$0xff] }
  0x19   : > { %364 = vmatpush.msra.mxu1 %v339_v7  ;;  %384 = vmatpush.msra.mxu2 %v340_v8  ;;  %v333_v15 = vld [vmem:[%s1280_s2 + $0x20] sm:$0xff]  ;;  %v330_v20 = vld [vmem:[%s1280_s2 + $0x8] sm:$0xff]  ;;  %v276_v21 = vld [vmem:[%s1279_s1 + $0x98] sm:$0xff]  ;;  %p819_p12 = pnand %p818_p11, %p941_p5  ;;  %p824_p2 = por %p823_p1, %p822_p0 }
  0x1a   : > { %321 = vmatpush.msra.mxu0 %v257_v9  ;;  %v329_v19 = vld [vmem:[%s1280_s2] sm:$0xff]  ;;  %v275_v22 = vld [vmem:[%s1279_s1 + $0x90] sm:$0xff]  ;;  %400 = vmatpush.msra.mxu3 %v276_v21  ;;  %v292_v23 = vld [vmem:[%s1279_s1 + $0x118] sm:$0xff] }
  0x1b   : > { %733 = vmatmul.msk.f32.vlgmr.msra.gmra.mxu0 %vm302_vm0, %v301_v11  ;;  %365 = vmatpush.msra.mxu1 %v337_v10  ;;  %v274_v24 = vld [vmem:[%s1279_s1 + $0x88] sm:$0xff]  ;;  %v291_v25 = vld [vmem:[%s1279_s1 + $0x110] sm:$0xff]  ;;  %v273_v27 = vld [vmem:[%s1279_s1 + $0x80] sm:$0xff]  ;;  %p820_p13 = pneg %p819_p12 }
  0x1c   : > { %385 = vmatpush.msra.mxu2 %v338_v12  ;;  %420 = vmatpush.msrb.mxu0 %v292_v23  ;;  %v290_v26 = vld [vmem:[%s1279_s1 + $0x108] sm:$0xff]  ;;  %v289_v28 = vld [vmem:[%s1279_s1 + $0x100] sm:$0xff]  ;;  %v272_v29 = vld [vmem:[%s1279_s1 + $0x78] sm:$0xff] }
  0x1d   : > { %366 = vmatpush.msra.mxu1 %v335_v13  ;;  %401 = vmatpush.msra.mxu3 %v275_v22  ;;  %v288_v30 = vld [vmem:[%s1279_s1 + $0xf8] sm:$0xff]  ;;  %v271_v31 = vld [vmem:[%s1279_s1 + $0x70] sm:$0xff]  ;;  %v270_v33 = vld [vmem:[%s1279_s1 + $0x68] sm:$0xff]  ;;  %p825_p3 = pnand %p824_p2, %p820_p13 }
  0x1e   : > { %386 = vmatpush.msra.mxu2 %v336_v14  ;;  %421 = vmatpush.msrb.mxu0 %v291_v25  ;;  %v287_v32 = vld [vmem:[%s1279_s1 + $0xf0] sm:$0xff]  ;;  %v286_v34 = vld [vmem:[%s1279_s1 + $0xe8] sm:$0xff]  ;;  %v269_v35 = vld [vmem:[%s1279_s1 + $0x60] sm:$0xff] }
  0x1f   : > { %367 = vmatpush.msra.mxu1 %v333_v15  ;;  %402 = vmatpush.msra.mxu3 %v274_v24  ;;  %v285_v36 = vld [vmem:[%s1279_s1 + $0xe0] sm:$0xff]  ;;  %v268_v37 = vld [vmem:[%s1279_s1 + $0x58] sm:$0xff]  ;;  %v267_v39 = vld [vmem:[%s1279_s1 + $0x50] sm:$0xff] }
  0x20   : > { %387 = vmatpush.msra.mxu2 %v334_v16  ;;  %422 = vmatpush.msrb.mxu0 %v290_v26  ;;  %v284_v38 = vld [vmem:[%s1279_s1 + $0xd8] sm:$0xff]  ;;  %v283_v40 = vld [vmem:[%s1279_s1 + $0xd0] sm:$0xff]  ;;  %v266_v41 = vld [vmem:[%s1279_s1 + $0x48] sm:$0xff] }
  0x21   : > { %368 = vmatpush.msra.mxu1 %v331_v17  ;;  %403 = vmatpush.msra.mxu3 %v273_v27  ;;  %v265_v42 = vld [vmem:[%s1279_s1 + $0x40] sm:$0xff]  ;;  %v264_v43 = vld [vmem:[%s1279_s1 + $0x38] sm:$0xff]  ;;  %v263_v49 = vld [vmem:[%s1279_s1 + $0x30] sm:$0xff] }
  0x22   : > { %388 = vmatpush.msra.mxu2 %v332_v18  ;;  %423 = vmatpush.msrb.mxu0 %v289_v28  ;;  %v247_v44 = vld [vmem:[%s1283_s5] ss:$0 sm:$0xff]  ;;  %v282_v50 = vld [vmem:[%s1279_s1 + $0xc8] sm:$0xff]  ;;  %v280_v54 = vld [vmem:[%s1279_s1 + $0xb8] sm:$0xff] }
  0x23   : > { %369 = vmatpush.msra.mxu1 %v329_v19  ;;  %404 = vmatpush.msra.mxu3 %v272_v29  ;;  %v262_v51 = vld [vmem:[%s1279_s1 + $0x28] sm:$0xff]  ;;  %v281_v52 = vld [vmem:[%s1279_s1 + $0xc0] sm:$0xff]  ;;  %v279_v55 = vld [vmem:[%s1279_s1 + $0xb0] sm:$0xff] }
  0x24   : > { %389 = vmatpush.msra.mxu2 %v330_v20  ;;  %424 = vmatpush.msrb.mxu0 %v288_v30  ;;  %v261_v53 = vld [vmem:[%s1279_s1 + $0x20] sm:$0xff]  ;;  %v278_v56 = vld [vmem:[%s1279_s1 + $0xa8] sm:$0xff]  ;;  %v300_v58 = vld [vmem:[%s1279_s1 + $0x158] sm:$0xff] }
  0x25   : > { %405 = vmatpush.msra.mxu3 %v271_v31  ;;  %v277_v57 = vld [vmem:[%s1279_s1 + $0xa0] sm:$0xff]  ;;  %v299_v59 = vld [vmem:[%s1279_s1 + $0x150] sm:$0xff]  ;;  %454 = vmatpush.msrb.mxu1 %v300_v58  ;;  %v298_v60 = vld [vmem:[%s1279_s1 + $0x148] sm:$0xff] }
  0x26   : > { %425 = vmatpush.msrb.mxu0 %v287_v32  ;;  %v297_v61 = vld [vmem:[%s1279_s1 + $0x140] sm:$0xff]  ;;  %v296_v9 = vld [vmem:[%s1279_s1 + $0x138] sm:$0xff]  ;;  %v295_v10 = vld [vmem:[%s1279_s1 + $0x130] sm:$0xff] }
  0x27   : > { %406 = vmatpush.msra.mxu3 %v270_v33  ;;  %455 = vmatpush.msrb.mxu1 %v299_v59  ;;  %v732_v62 = vld [vmem:[%s1283_s5 + $0x1] ss:$8 sm:$0x3]  ;;  %v476_v13 = vld [vmem:[%s1281_s3 + $0x38] sm:$0xff]  ;;  %v475_v14 = vld [vmem:[%s1281_s3 + $0x30] sm:$0xff] }
  0x28   : > { %426 = vmatpush.msrb.mxu0 %v286_v34  ;;  %v346_v63 = vperm.slane %v732_v62, 0  ;;  %v347_v2 = vperm.slane %v732_v62, 1  ;;  %v294_v11 = vld [vmem:[%s1279_s1 + $0x128] sm:$0xff]  ;;  %v293_v12 = vld [vmem:[%s1279_s1 + $0x120] sm:$0xff]  ;;  %488 = vmatpush.msrb.mxu2 %v476_v13  ;;  %v472_v17 = vld [vmem:[%s1281_s3 + $0x18] sm:$0xff] }
  0x29   : > { %407 = vmatpush.msra.mxu3 %v269_v35  ;;  %456 = vmatpush.msrb.mxu1 %v298_v60  ;;  %v474_v15 = vld [vmem:[%s1281_s3 + $0x28] sm:$0xff]  ;;  %v473_v16 = vld [vmem:[%s1281_s3 + $0x20] sm:$0xff]  ;;  %v471_v25 = vld [vmem:[%s1281_s3 + $0x10] sm:$0xff] }
  0x2a   : > { %427 = vmatpush.msrb.mxu0 %v285_v36  ;;  %489 = vmatpush.msrb.mxu2 %v475_v14  ;;  %v250_v18 = vld [vmem:[%s1283_s5 + $0x2] ss:$0 sm:$0xff]  ;;  %v470_v26 = vld [vmem:[%s1281_s3 + $0x8] sm:$0xff]  ;;  %v253_v28 = vld [vmem:[%s1283_s5 + $0x5] ss:$0 sm:$0xff] }
  0x2b   : > { %408 = vmatpush.msra.mxu3 %v268_v37  ;;  %457 = vmatpush.msrb.mxu1 %v297_v61  ;;  %v469_v27 = vld [vmem:[%s1281_s3] sm:$0xff]  ;;  %v255_v35 = vld [vmem:[%s1283_s5 + $0x10] sm:$0xff] }
  0x2c   : > { %428 = vmatpush.msrb.mxu0 %v284_v38  ;;  %490 = vmatpush.msrb.mxu2 %v474_v15  ;;  %v251_v29 = vld [vmem:[%s1283_s5 + $0x3] ss:$0 sm:$0xff]  ;;  %v252_v37 = vld [vmem:[%s1283_s5 + $0x4] ss:$0 sm:$0xff]  ;;  %v254_v61 = vld [vmem:[%s1283_s5 + $0x6] ss:$0 sm:$0xff] }
  0x2d   : > { %409 = vmatpush.msra.mxu3 %v267_v39  ;;  %458 = vmatpush.msrb.mxu1 %v296_v9  ;;  %v256_v34 = vld [vmem:[%s1283_s5 + $0x20] sm:$0xff] }
  0x2e   : > { %429 = vmatpush.msrb.mxu0 %v283_v40  ;;  %491 = vmatpush.msrb.mxu2 %v473_v16 }
  0x2f   : > { %410 = vmatpush.msra.mxu3 %v266_v41  ;;  %459 = vmatpush.msrb.mxu1 %v295_v10 }
  0x30   : > { %430 = vmatpush.msrb.mxu0 %v282_v50  ;;  %492 = vmatpush.msrb.mxu2 %v472_v17  ;;  %v564_v50 = vld [vmem:[%s1282_s4 + $0x18] sm:$0xff] }
  0x31   : > { %411 = vmatpush.msra.mxu3 %v265_v42  ;;  %460 = vmatpush.msrb.mxu1 %v294_v11 }
  0x32   : > { %431 = vmatpush.msrb.mxu0 %v281_v52  ;;  %493 = vmatpush.msrb.mxu2 %v471_v25  ;;  %v566_v52 = vld [vmem:[%s1282_s4 + $0x28] sm:$0xff] }
  0x33   : > { %412 = vmatpush.msra.mxu3 %v264_v43  ;;  %461 = vmatpush.msrb.mxu1 %v293_v12 }
  0x34   : > { %432 = vmatpush.msrb.mxu0 %v280_v54  ;;  %494 = vmatpush.msrb.mxu2 %v470_v26  ;;  %v562_v54 = vld [vmem:[%s1282_s4 + $0x8] sm:$0xff] }
  0x35   : > { %413 = vmatpush.msra.mxu3 %v263_v49  ;;  %501 = vrot.lane.b32.xlu0 %v253_v28, %s865_s19  ;;  %v569_v49 = vld [vmem:[%s1282_s4 + $0x40] sm:$0xff] }
  0x36   : > { %433 = vmatpush.msrb.mxu0 %v279_v55  ;;  %495 = vmatpush.msrb.mxu2 %v469_v27  ;;  %v563_v55 = vld [vmem:[%s1282_s4 + $0x10] sm:$0xff] }
  0x37   : > { %414 = vmatpush.msra.mxu3 %v262_v51  ;;  %v565_v51 = vld [vmem:[%s1282_s4 + $0x20] sm:$0xff] }
  0x38   : > { %434 = vmatpush.msrb.mxu0 %v278_v56 }
  0x39   : > { %415 = vmatpush.msra.mxu3 %v261_v53  ;;  %v561_v53 = vld [vmem:[%s1282_s4] sm:$0xff] }
  0x3a   : > { %435 = vmatpush.msrb.mxu0 %v277_v57 }
  0x98   : > { %v323_v45 = vpop.f32.mrf.mxu0 }
  0x99   : > { %v324_v46 = vadd.f32 %v323_v45, %v247_v44  ;;  %v570_v44 = vld [vmem:[%s1282_s4 + $0x48] sm:$0xff]  ;;  %v571_v45 = vld [vmem:[%s1282_s4 + $0x50] sm:$0xff] }
  0x9a   : > { %608 = vmatpush.msrb.mxu3 %v571_v45 }
  0x9b   : > { %v327_v47 = vmul.f32 0.2, %v324_v46  ;;  %vm326_vm1 = vcmp.gt.f32.partialorder %v324_v46, 0.0 }
  0x9d   : > { %v328_v48 = vsel %vm326_vm1, %v324_v46, %v327_v47  ;;  %v572_v46 = vld [vmem:[%s1282_s4 + $0x58] sm:$0xff]  ;;  %v567_v47 = vld [vmem:[%s1282_s4 + $0x30] sm:$0xff] }
  0x9e   : > { %734 = vmatmul.msk.f32.vlgmr.msra.gmra.mxu1 %vm350_vm2, %v328_v48  ;;  %735 = vmatmul.msk.f32.vlgmr.msra.gmra.mxu2 %vm350_vm2, %v328_v48  ;;  %v568_v48 = vld [vmem:[%s1282_s4 + $0x38] sm:$0xff] }
  0x9f   : > { %528 = vmatpush.msra.mxu1 %v256_v34  ;;  %588 = vmatpush.msra.mxu2 %v570_v44 }
  0xa0   : > { %628 = vmatpush.msra.mxu0 %v572_v46  ;;  %609 = vmatpush.msrb.mxu3 %v568_v48 }
  0xa1   : > { %529 = vmatpush.msra.mxu1 %v255_v35  ;;  %589 = vmatpush.msra.mxu2 %v567_v47 }
  0xa2   : > { %629 = vmatpush.msra.mxu0 %v569_v49  ;;  %610 = vmatpush.msrb.mxu3 %v565_v51 }
  0xa3   : > { %590 = vmatpush.msra.mxu2 %v564_v50 }
  0xa4   : > { %630 = vmatpush.msra.mxu0 %v566_v52  ;;  %611 = vmatpush.msrb.mxu3 %v562_v54 }
  0xa5   : > { %591 = vmatpush.msra.mxu2 %v561_v53 }
  0xa6   : > { %631 = vmatpush.msra.mxu0 %v563_v55 }
  0xa7   : > { %v502_v36 = vpop.permute.xlu0 %501 }
 0x11b   : > { %v371_v0 = vpop.f32.mrf.mxu1 }
 0x11c   : > { %v372_v1 = vadd.f32 %v371_v0, %v346_v63 }
 0x11e   : > { %vm394_vm3 = vcmp.gt.f32.partialorder %v372_v1, 0.0  ;;  %v396_v3 = vmul.f32 0.2, %v372_v1 }
 0x120   : > { %v398_v4 = vsel %vm394_vm3, %v372_v1, %v396_v3 }
 0x121   : > { %v391_v5 = vpop.f32.mrf.mxu2  ;;  %416 = vmatmul.f32.vlgmr.msra.gmra.mxu3 %v398_v4 }
 0x122   : > { %v392_v6 = vadd.f32 %v391_v5, %v347_v2 }
 0x124   : > { %v397_v7 = vmul.f32 0.2, %v392_v6  ;;  %vm395_vm4 = vcmp.gt.f32.partialorder %v392_v6, 0.0 }
 0x126   : > { %v399_v8 = vsel %vm395_vm4, %v392_v6, %v397_v7 }
 0x127   : > { %436 = vmatmul.f32.vlgmr.msrb.gmra.mxu0 %v399_v8 }
 0x1a4   : > { %v417_v19 = vpop.f32.mrf.mxu3  ;;  %v437_v21 = vpop.f32.mrf.mxu0 }
 0x1a5   : > { %v418_v20 = vadd.f32 %v417_v19, %v250_v18 }
 0x1a7   : > { %v438_v22 = vadd.f32 %v437_v21, %v418_v20 }
 0x1a9   : > { %vm440_vm5 = vcmp.gt.f32.partialorder %v438_v22, 0.0  ;;  %v441_v23 = vmul.f32 0.2, %v438_v22 }
 0x1ab   : > { %v442_v24 = vsel %vm440_vm5, %v438_v22, %v441_v23  ;;  %v867_v22 = vmov 0.0  }
 0x1ac   : > { %736 = vmatmul.msk.f32.vlgmr.msrb.gmra.mxu1 %vm350_vm2, %v442_v24 }
 0x229   : > { %v463_v30 = vpop.f32.mrf.mxu1 }
 0x22a   : > { %v464_v31 = vadd.f32 %v463_v30, %v251_v29 }
 0x22c   : > { %vm466_vm6 = vcmp.gt.f32.partialorder %v464_v31, 0.0  ;;  %v467_v32 = vmul.f32 0.2, %v464_v31 }
 0x22e   : > { %v468_v33 = vsel %vm466_vm6, %v464_v31, %v467_v32 }
 0x22f   : > { %737 = vmatmul.msk.f32.vlgmr.msrb.gmra.mxu2 %vm350_vm2, %v468_v33 }
 0x2b2   : > { %v497_v38 = vpop.f32.mrf.mxu2 }
 0x2b3   : > { %v504_v39 = vadd.f32 %v502_v36, %v497_v38  ;;  %v554_v40 = vadd.f32 %v497_v38, %v252_v37 }
 0x2b5   : > { %v555_v41 = vsel %vm302_vm0, %v554_v40, -inf  ;;  %vm505_vm7 = vcmp.gt.f32.partialorder %v504_v39, 0.0  ;;  %v506_v42 = vmul.f32 0.2, %v504_v39 }
 0x2b6   : > { %556 = vmax.xlane.f32.xlu1 %v555_v41 }
 0x2b7   : > { %v507_v43 = vsel %vm505_vm7, %v504_v39, %v506_v42 }
 0x2b8   : > { %509 = vrot.lane.b32.xlu0 %v507_v43, %s866_s17  ;;  %s730_s17 = sshll.u32 %s240_s16, 4 }
 0x2b9   : > { %s1236_s18 = scalar_lea.vmem [#allocation2], %s730_s17 }
 0x2ba   : > { %s664_s9 = sshll.u32 %s1236_s18, 4  ;;  %s665_s9 = int_to_ptr.vmem [resolvable:$true] %s664_s9 }
 0x329   : > { %v557_v56 = vpop.xlane.xlu1 %556 }
 0x32a   : > { %v558_v57 = vsub.f32 %v554_v40, %v557_v56  ;;  %v510_v58 = vpop.permute.xlu0 %509 }
 0x32b   : > { %738 = vmatmul.msk.f32.vlgmr.msra.gmra.mxu1 %vm511_vm8, %v510_v58 }
 0x32c   : > { %v559_v59 = vmul.f32 1.442695, %v558_v57 }
 0x32e   : > { %791 = vpow2.f32 %v559_v59 }
 0x334   : > { %v792_v60 = vpop.eup %791 }
 0x335   : > { %740 = vmatmul.msk.f32.vlgmr.msra.gmra.mxu2 %vm302_vm0, %v792_v60  ;;  %741 = vmatmul.msk.f32.vlgmr.msrb.gmra.mxu3 %vm302_vm0, %v792_v60 }
 0x336   : > { %742 = vmatmul.msk.f32.vlgmr.msra.gmra.mxu0 %vm302_vm0, %v792_v60 }
 0x3a8   : > { %v531_v62 = vpop.f32.mrf.mxu1 }
 0x3a9   : > { %v532_v63 = vadd.f32 %v531_v62, %v254_v61 }
 0x3ab   : > { %v739_v0 = vmul.f32 -1.442695, %v532_v63 }
 0x3ad   : > { %793 = vpow2.f32 %v739_v0 }
 0x3b3   : > { %v794_v1 = vpop.eup %793  ;;  %v633_v2 = vpop.f32.mrf.mxu0 }
 0x3b4   : > { %v537_v3 = vadd.f32 1.0, %v794_v1  ;;  %795 = vrcp.f32 %v633_v2 }
 0x3b6   : > { %797 = vrcp.f32 %v537_v3  ;;  %v549_v13 = vand.u32 2147483648, %v537_v3  ;;  %v547_v15 = vand.u32 2147483647, %v537_v3  ;;  %vm543_vm10 = vweird.f32 %v537_v3 }
 0x3b8   : > { %v613_v4 = vpop.f32.mrf.mxu3  ;;  %v593_v10 = vpop.f32.mrf.mxu2  ;;  %v550_v17 = vor.u32 1.1754944e-38, %v549_v13  ;;  %vm548_vm12 = vcmp.eq.f32.partialorder %v547_v15, 8.507059e+37 }
 0x3b9   : > { %799 = vrcp.f32 %v613_v4 }
 0x3ba   : > { %v796_v5 = vpop.eup %795 }
 0x3bb   : > { %v639_v6 = vmul.f32 %v796_v5, %v792_v60 }
 0x3bc   : > { %v798_v7 = vpop.eup %797 }
 0x3bd   : > { %v539_v8 = vmul.f32 %v798_v7, %v537_v3  ;;  %641 = vst.msk [vmem:[%s1236_s18 + $0x8] sm:$0xff] %vm302_vm0, %v639_v6  ;;  %vm544_vm9 = vweird.f32 %v798_v7 }
 0x3be   : > { %vm545_vm11 = vmor %vm543_vm10, %vm544_vm9 }
 0x3bf   : > { %v800_v9 = vpop.eup %799  ;;  %v540_v11 = vsub.f32 1.0, %v539_v8 }
 0x3c0   : > { %v637_v12 = vmul.f32 %v800_v9, %v593_v10 }
 0x3c1   : > { %v541_v14 = vmul.f32 %v798_v7, %v540_v11 }
 0x3c2   : > { %640 = vst [vmem:[%s1236_s18] sm:$0xff] %v637_v12 }
 0x3c3   : > { %v542_v16 = vadd.f32 %v798_v7, %v541_v14 }
 0x3c5   : > { %v546_v18 = vsel %vm545_vm11, %v798_v7, %v542_v16 }
 0x3c6   : > { %v551_v19 = vsel %vm548_vm12, %v550_v17, %v546_v18 }
 0x3c7   : > { %v553_v20 = vmul.f32 100.0, %v551_v19 }
 0x3c9   : > { %643 = vrot.lane.b32.xlu1 %v553_v20, %s865_s19 }
 0x43b   : > { %v644_v21 = vpop.permute.xlu1 %643 }
 0x43c   : > { %647 = vst.msk [vmem:[%s1236_s18 + $0x8] sm:$0xff] %vm646_vm13, %v644_v21 }
 0x43d   : > { %649 = vst.msk [vmem:[%s1236_s18 + $0x8] sm:$0xff] %vm648_vm14, %v867_v22 }
 0x43e   : > { %828 = shalt.err (!%p825_p3)
}
 0x43f   : > { %749 = dma.vmem_to_hbm [thread:$0]  (%p941_p5), %s665_s9, 256, %s667_s10, %s651_s11  }
 0x440 PF: > { %p755_p4 = scmp.ge.s32.totalorder %s863_s24, 2  ;;  %s678_s16 = sand.u32 1, %s851_s21  }
 0x441   : > { %s679_s18 = scalar_lea.sflag [#allocation3], %s678_s16 }
 0x442   : > { %p752_p7 = pnand %p755_p4, %p945_p6 }
 0x444   : > { %p753_p8 = pneg %p752_p7 }
 0x446   : > { %846 = dma.done.wait (%p753_p8), %s679_s18, 256  }
 0x447   : > { %848 = vsyncadd (%p753_p8), %s679_s18, 4294967040  ;;  %p16_p9 = scmp.ge.s32.totalorder %s928_s27, 4   ;;  %s1287_s21 = smov %s855_s22 }
 0x448   : > { %s1288_s22 = smov %s859_s23  ;;  %s1289_s23 = smov %s939_s30 }
 0x449   : > { %s1290_s24 = smov %s928_s27  ;;  %18 = sbr.rel (!%p16_p9) target bundleno = 3 (0x3), region = 80 }
 0x44e   :  { %685 = vsyncpa [#allocation3], 1 }
 0x44f   :  { %687 = vsyncpa [#allocation3 + $0x1], 1 }

</bundles_post_ra>
